<compile_context>
chip_gen: v7x
topology: tpu7x:2x2x1
jax: 0.10.0
libtpu: 0.0.40
codegen_flags: <defaults>
</compile_context>

<pallas_src>
import functools

import numpy as np
import jax
import jax.numpy as jnp
from jax.experimental import pallas as pl
from jax.experimental.pallas import tpu as pltpu

EPS = 1e-5


def _vspec():
    # whole-array operand resident in VMEM (used for the small, grid-less kernel A)
    return pl.BlockSpec(memory_space=pltpu.MemorySpace.VMEM)


# ----------------------------------------------------------------------------
# Static structure matrices (host-side, tiny, live in VMEM inside the kernels)
# ----------------------------------------------------------------------------
def bilinear_matrix(in_size, out_size):
    """(out_size, in_size) interpolation matrix, bilinear align_corners=True."""
    if in_size == 1 or out_size == 1:
        m = np.zeros((out_size, in_size), np.float32)
        m[:, 0] = 1.0
        return m
    i = np.arange(out_size, dtype=np.float64)
    src = i * (in_size - 1) / (out_size - 1)
    i0 = np.clip(np.floor(src).astype(np.int64), 0, in_size - 1)
    i1 = np.minimum(i0 + 1, in_size - 1)
    f = (src - i0).astype(np.float32)
    m = np.zeros((out_size, in_size), np.float32)
    m[np.arange(out_size), i0] += 1.0 - f
    m[np.arange(out_size), i1] += f
    return m


def avgpool_matrix(in_size, r):
    """(in_size//r, in_size) non-overlapping r-average matrix."""
    out = in_size // r
    m = np.zeros((out, in_size), np.float32)
    for o in range(out):
        m[o, o * r:(o + 1) * r] = 1.0 / r
    return m


# ----------------------------------------------------------------------------
# Kernel A: avgpool + depthwise(k=1) + BN1 + PReLU + pointwise 1x1
#           (whole-array; emits the zero-padded conv output slab)
# ----------------------------------------------------------------------------
def _fused_mid_kernel(x_ref, ph_ref, pw_ref, dw_w_t_ref, g1_ref, b1_ref,
                      alpha_ref, w_pw_ref, w_pw_big_ref, s_in_ref, t_in_ref,
                      t_border_ref, z_ref, *, n_img, hp, wp, hz, wz, c_out):
    # AvgPool2d(r, r): H-pool as a left matmul, W-pool as a channel-interleaved
    # block matmul on the lane axis (no relayout, no HBM round trip).
    xh = jnp.dot(ph_ref[...], x_ref[...], preferred_element_type=jnp.float32)
    xp = jnp.dot(xh, pw_ref[...], preferred_element_type=jnp.float32)   # (N*Hp, Wp*C)

    # Depthwise Conv2d(C, C, k=1, groups=C): per-channel scale.  The depthwise
    # bias adds the same constant to every pixel of a channel (the zero-padded
    # border becomes exactly the bias), so training-mode BN1 cancels it -> dropped.
    y = xp * dw_w_t_ref[...]

    # BatchNorm2d(C), training mode.  Stats run over all N*Hz*Wz conv-output
    # pixels; with the bias dropped, the zero-pad border contributes zeros, so
    # only the interior sums are needed (the count still includes the border).
    colsum = jnp.sum(y, axis=0, keepdims=True)                  # (1, Wp*C)
    colsq = jnp.sum(y * y, axis=0, keepdims=True)
    sum_c = jnp.dot(colsum, s_in_ref[...], preferred_element_type=jnp.float32)  # (1, C)
    sq_c = jnp.dot(colsq, s_in_ref[...], preferred_element_type=jnp.float32)
    inv_cnt = 1.0 / float(n_img * hz * wz)
    mean = sum_c * inv_cnt
    var = sq_c * inv_cnt - mean * mean                          # biased variance
    scale_c = jax.lax.rsqrt(var + EPS) * g1_ref[...]            # (1, C)
    shift_c = b1_ref[...] - mean * scale_c
    scale_t = jnp.dot(scale_c, t_in_ref[...], preferred_element_type=jnp.float32)
    shift_t = jnp.dot(shift_c, t_in_ref[...], preferred_element_type=jnp.float32)
    yb = y * scale_t + shift_t

    # PReLU (single shared alpha)
    a = alpha_ref[...]                                          # (1, 1)
    ya = jnp.maximum(yb, 0.0) + a * jnp.minimum(yb, 0.0)

    # Pointwise Conv2d(C, C_out, 1) on the channel-interleaved slab via a
    # block-diagonal weight (lanes stay dense, no in-kernel relayout).  Its bias
    # passes unchanged through the weights-sum-to-1 bilinear upsample and is
    # cancelled by the final BatchNorm -> dropped.
    z_int = jnp.dot(ya, w_pw_big_ref[...], preferred_element_type=jnp.float32)

    # Same chain applied to the zero-pad border value (per-channel constant),
    # then assemble the padded conv-output slab: fill border, write interior.
    bb = shift_c                                                # BN1 of 0
    ba = jnp.maximum(bb, 0.0) + a * jnp.minimum(bb, 0.0)
    z_border = jnp.dot(ba, w_pw_ref[...], preferred_element_type=jnp.float32)    # (1, C_out)
    border_row = jnp.dot(z_border, t_border_ref[...],
                         preferred_element_type=jnp.float32)    # (1, Wz*C_out)
    z_ref[...] = jnp.broadcast_to(border_row, (n_img * hz, wz * c_out))
    for n in range(n_img):                                      # static, small N
        r0 = n * hz + 1
        z_ref[r0:r0 + hp, c_out:(wp + 1) * c_out] = z_int[n * hp:(n + 1) * hp, :]


# ----------------------------------------------------------------------------
# Kernel B: BN2 statistics over the (recomputed) bilinear-upsampled output.
#           Grid over batch, sequential accumulation (pl.when init / finalize).
# ----------------------------------------------------------------------------
def _upsample_stats_kernel(z_ref, mh_ref, mwbig_ref, s_out_ref, stats_ref):
    @pl.when(pl.program_id(0) == 0)
    def _():
        stats_ref[...] = jnp.zeros_like(stats_ref)

    up = jnp.dot(jnp.dot(mh_ref[...], z_ref[...], preferred_element_type=jnp.float32),
                 mwbig_ref[...], preferred_element_type=jnp.float32)   # (Ho, Wo*C_out)
    colsum = jnp.sum(up, axis=0, keepdims=True)
    colsq = jnp.sum(up * up, axis=0, keepdims=True)
    psum = jnp.dot(colsum, s_out_ref[...], preferred_element_type=jnp.float32)   # (1, C_out)
    psq = jnp.dot(colsq, s_out_ref[...], preferred_element_type=jnp.float32)
    stats_ref[...] += jnp.concatenate([psum, psq], axis=0)


# ----------------------------------------------------------------------------
# Kernel C: bilinear upsample + BN2 normalize + write (grid over batch, parallel)
# ----------------------------------------------------------------------------
def _upsample_bn_kernel(z_ref, mh_ref, mwbig_ref, stats_ref, g2_ref, b2_ref,
                        t_out_ref, o_ref, *, count):
    up = jnp.dot(jnp.dot(mh_ref[...], z_ref[...], preferred_element_type=jnp.float32),
                 mwbig_ref[...], preferred_element_type=jnp.float32)
    inv_n = 1.0 / count
    mean = stats_ref[0:1, :] * inv_n
    var = stats_ref[1:2, :] * inv_n - mean * mean
    scale_c = jax.lax.rsqrt(var + EPS) * g2_ref[...]
    shift_c = b2_ref[...] - mean * scale_c
    scale_t = jnp.dot(scale_c, t_out_ref[...], preferred_element_type=jnp.float32)
    shift_t = jnp.dot(shift_c, t_out_ref[...], preferred_element_type=jnp.float32)
    o_ref[...] = up * scale_t + shift_t


# ----------------------------------------------------------------------------
# Forward
# ----------------------------------------------------------------------------
@functools.partial(jax.jit, static_argnames=("reduce_ratio",))
def s2block_forward(x_nhwc, params, *, reduce_ratio):
    r = reduce_ratio
    n, h, w, c = x_nhwc.shape
    c_out = params["w_pw"].shape[1]
    hp, wp = h // r, w // r            # after AvgPool2d(r, r)
    hz, wz = hp + 2, wp + 2            # depthwise k=1, padding=1 grows spatial by 2
    ho, wo = r * hz, r * wz            # after UpsamplingBilinear2d(scale_factor=r)
    f32 = jnp.float32

    # --- static structure matrices (all tiny, VMEM resident inside kernels) ---
    eye_in = np.eye(c, dtype=np.float32)
    eye_out = np.eye(c_out, dtype=np.float32)
    p_h = jnp.asarray(np.kron(np.eye(n, dtype=np.float32), avgpool_matrix(h, r)))
    p_w = jnp.asarray(np.kron(avgpool_matrix(w, r).T, eye_in))        # (W*C, Wp*C)
    s_in = jnp.asarray(np.kron(np.ones((wp, 1), np.float32), eye_in))  # (Wp*C, C)
    t_in = jnp.asarray(np.kron(np.ones((1, wp), np.float32), eye_in))  # (C, Wp*C)
    t_border = jnp.asarray(np.kron(np.ones((1, wz), np.float32), eye_out))
    t_big = jnp.asarray(np.kron(np.ones((1, r * wz), np.float32), eye_out))
    s_out = jnp.asarray(np.kron(np.ones((r * wz, 1), np.float32), eye_out))
    m_h = jnp.asarray(bilinear_matrix(hz, ho))                         # (Ho, Hz)
    m_w_big = jnp.asarray(np.kron(bilinear_matrix(wz, wo).T, eye_out))  # (Wz*Co, Wo*Co)
    w_pw_big = jnp.kron(jnp.eye(wp, dtype=f32), params["w_pw"])        # (Wp*C, Wp*Co)
    dw_w_t = jnp.tile(params["dw_w"], (1, wp))                         # (1, Wp*C)

    # lane-dense slab: rows = N*H pixels-rows, lanes = W*C (channel fastest)
    x_slab = x_nhwc.reshape(n * h, w * c)

    # Kernel A: pool + depthwise + BN1 + PReLU + pointwise -> padded z slab
    z_pad = pl.pallas_call(
        functools.partial(_fused_mid_kernel, n_img=n, hp=hp, wp=wp, hz=hz,
                          wz=wz, c_out=c_out),
        out_shape=jax.ShapeDtypeStruct((n * hz, wz * c_out), f32),
        in_specs=[_vspec()] * 12,
        out_specs=_vspec(),
    )(x_slab, p_h, p_w, dw_w_t, params["g1"], params["b1"], params["alpha"],
      params["w_pw"], w_pw_big, s_in, t_in, t_border)

    # Kernel B: BN2 batch statistics (sum / sumsq), grid over batch, sequential
    stats = pl.pallas_call(
        _upsample_stats_kernel,
        out_shape=jax.ShapeDtypeStruct((2, c_out), f32),
        grid=(n,),
        in_specs=[
            pl.BlockSpec((hz, wz * c_out), lambda i: (i, 0)),
            pl.BlockSpec((ho, hz), lambda i: (0, 0)),
            pl.BlockSpec((wz * c_out, wo * c_out), lambda i: (0, 0)),
            pl.BlockSpec((wo * c_out, c_out), lambda i: (0, 0)),
        ],
        out_specs=pl.BlockSpec((2, c_out), lambda i: (0, 0)),
        compiler_params=pltpu.CompilerParams(dimension_semantics=("arbitrary",)),
    )(z_pad, m_h, m_w_big, s_out)

    # Kernel C: upsample + BN2 apply; each batch element is an independent tile
    out_slab = pl.pallas_call(
        functools.partial(_upsample_bn_kernel, count=float(n * ho * wo)),
        out_shape=jax.ShapeDtypeStruct((n * ho, wo * c_out), f32),
        grid=(n,),
        in_specs=[
            pl.BlockSpec((hz, wz * c_out), lambda i: (i, 0)),
            pl.BlockSpec((ho, hz), lambda i: (0, 0)),
            pl.BlockSpec((wz * c_out, wo * c_out), lambda i: (0, 0)),
            pl.BlockSpec((2, c_out), lambda i: (0, 0)),
            pl.BlockSpec((1, c_out), lambda i: (0, 0)),
            pl.BlockSpec((1, c_out), lambda i: (0, 0)),
            pl.BlockSpec((c_out, wo * c_out), lambda i: (0, 0)),
        ],
        out_specs=pl.BlockSpec((ho, wo * c_out), lambda i: (i, 0)),
        compiler_params=pltpu.CompilerParams(dimension_semantics=("parallel",)),
    )(z_pad, m_h, m_w_big, stats, params["g2"], params["b2"], t_big)

    return out_slab.reshape(n, ho, wo, c_out)


# ----------------------------------------------------------------------------
# Pure-JAX reference (keeps both conv biases; validates the kernel path)
# ----------------------------------------------------------------------------
def s2block_reference(x, p, r):
    n, h, w, c = x.shape
    hp, wp = h // r, w // r
    c_out = p["w_pw"].shape[1]
    # AvgPool2d(r, r)
    xp = x.reshape(n, hp, r, wp, r, c).mean(axis=(2, 4))
    # depthwise Conv2d(C, C, k=1, groups=C, padding=1): zero-pad then w*x + b
    xpad = jnp.pad(xp, ((0, 0), (1, 1), (1, 1), (0, 0)))
    y = xpad * p["dw_w"].reshape(1, 1, 1, c) + p["dw_b"].reshape(1, 1, 1, c)
    # BatchNorm2d(C), training mode (biased variance)
    m = jnp.mean(y, axis=(0, 1, 2))
    v = jnp.mean((y - m) ** 2, axis=(0, 1, 2))
    y = (y - m) * jax.lax.rsqrt(v + EPS) * p["g1"].reshape(1, 1, 1, c) \
        + p["b1"].reshape(1, 1, 1, c)
    # PReLU (single shared alpha)
    y = jnp.maximum(y, 0.0) + p["alpha"][0, 0] * jnp.minimum(y, 0.0)
    # pointwise Conv2d(C, C_out, 1)
    z = jnp.sum(y[..., :, None] * p["w_pw"][None, None, None, :, :], axis=-2) \
        + p["b_pw"].reshape(1, 1, 1, c_out)
    # UpsamplingBilinear2d(scale_factor=r), align_corners=True
    hz, wz = hp + 2, wp + 2
    ho, wo = r * hz, r * wz

    def interp_1d(a, axis, in_size, out_size):
        i = np.arange(out_size, dtype=np.float64)
        src = i * (in_size - 1) / (out_size - 1)
        i0 = np.clip(np.floor(src).astype(np.int64), 0, in_size - 1)
        i1 = np.minimum(i0 + 1, in_size - 1)
        f = jnp.asarray((src - i0).astype(np.float32))
        shape = [1] * a.ndim
        shape[axis] = out_size
        f = f.reshape(shape)
        return jnp.take(a, i0, axis=axis) * (1.0 - f) + jnp.take(a, i1, axis=axis) * f

    z = interp_1d(z, 1, hz, ho)
    z = interp_1d(z, 2, wz, wo)
    # BatchNorm2d(C_out), training mode
    m2 = jnp.mean(z, axis=(0, 1, 2))
    v2 = jnp.mean((z - m2) ** 2, axis=(0, 1, 2))
    return (z - m2) * jax.lax.rsqrt(v2 + EPS) * p["g2"].reshape(1, 1, 1, c_out) \
        + p["b2"].reshape(1, 1, 1, c_out)


def init_params(key, c_in, c_out):
    ks = jax.random.split(key, 8)
    f32 = jnp.float32
    return {
        # depthwise Conv2d(C, C, k=1, groups=C): per-channel weight + bias
        "dw_w": 1.0 + 0.1 * jax.random.normal(ks[0], (1, c_in), f32),
        "dw_b": 0.1 * jax.random.normal(ks[1], (1, c_in), f32),
        # BatchNorm2d(C) affine
        "g1": 1.0 + 0.1 * jax.random.normal(ks[2], (1, c_in), f32),
        "b1": 0.1 * jax.random.normal(ks[3], (1, c_in), f32),
        # PReLU single shared parameter (PyTorch default init 0.25)
        "alpha": jnp.full((1, 1), 0.25, f32),
        # pointwise Conv2d(C, C_out, 1)
        "w_pw": 0.1 * jax.random.normal(ks[4], (c_in, c_out), f32),
        "b_pw": 0.1 * jax.random.normal(ks[5], (1, c_out), f32),
        # BatchNorm2d(C_out) affine
        "g2": 1.0 + 0.1 * jax.random.normal(ks[6], (1, c_out), f32),
        "b2": 0.1 * jax.random.normal(ks[7], (1, c_out), f32),
    }


if __name__ == "__main__":
    key = jax.random.PRNGKey(0)
    # S2Block(reduce_ratio=2, in_channels=4, out_channels=4, kernel_size=3,
    #         padding=1, kernel_per_layer=1) on NCHW input (2, 4, 12, 12).
    # This script keeps activations in NHWC: x -> (2, 12, 12, 4).  H=W=12 is
    # chosen so the per-image row counts of the padded (Hp+2=8) and upsampled
    # (2*(Hp+2)=16) slabs are sublane-aligned (multiples of 8) for the grid.
    N, C_IN, C_OUT, H, W, R = 2, 4, 4, 12, 12, 2
    kx, kp = jax.random.split(key)
    x = jax.random.normal(kx, (N, H, W, C_IN), dtype=jnp.float32)
    params = init_params(kp, C_IN, C_OUT)

    out = s2block_forward(x, params, reduce_ratio=R)
    out = jax.block_until_ready(out)

    assert out.shape == (N, R * (H // R + 2), R * (W // R + 2), C_OUT), out.shape
    assert bool(jnp.all(jnp.isfinite(out)))
    ref = s2block_reference(x, params, R)
    assert bool(jnp.max(jnp.abs(out - ref)) < 5e-2), float(jnp.max(jnp.abs(out - ref)))
    print("KERNEL_OK")
</pallas_src>

<mosaic_0001>
module attributes {stable_mosaic.version = 11 : i64} {
  func.func @_fused_mid_kernel(%arg0: memref<24x48xf32, #tpu.memory_space<vmem>>, %arg1: memref<12x24xf32, #tpu.memory_space<vmem>>, %arg2: memref<48x24xf32, #tpu.memory_space<vmem>>, %arg3: memref<1x24xf32, #tpu.memory_space<vmem>>, %arg4: memref<1x4xf32, #tpu.memory_space<vmem>>, %arg5: memref<1x4xf32, #tpu.memory_space<vmem>>, %arg6: memref<1x1xf32, #tpu.memory_space<vmem>>, %arg7: memref<4x4xf32, #tpu.memory_space<vmem>>, %arg8: memref<24x24xf32, #tpu.memory_space<vmem>>, %arg9: memref<24x4xf32, #tpu.memory_space<vmem>>, %arg10: memref<4x24xf32, #tpu.memory_space<vmem>>, %arg11: memref<4x32xf32, #tpu.memory_space<vmem>>, %arg12: memref<16x32xf32, #tpu.memory_space<vmem>>) attributes {dimension_semantics = [], scalar_prefetch = 0 : i64, scratch_operands = 0 : i64, tpu.core_type = #tpu.core_type<tc>} {
    %c0 = arith.constant 0 : index
    %c0_0 = arith.constant 0 : index
    %0 = vector.load %arg1[%c0, %c0_0] : memref<12x24xf32, #tpu.memory_space<vmem>>, vector<12x24xf32>
    %c0_1 = arith.constant 0 : index
    %c0_2 = arith.constant 0 : index
    %1 = vector.load %arg0[%c0_1, %c0_2] : memref<24x48xf32, #tpu.memory_space<vmem>>, vector<24x48xf32>
    %cst = arith.constant dense<0.000000e+00> : vector<12x48xf32>
    %2 = tpu.matmul %0, %1, %cst {dimension_numbers = #tpu.dot_dimension_numbers<[1], [0], [0], [1], [0, 0, 1, 1], [], []>} : vector<12x24xf32>, vector<24x48xf32>, vector<12x48xf32> -> vector<12x48xf32>
    %c0_3 = arith.constant 0 : index
    %c0_4 = arith.constant 0 : index
    %3 = vector.load %arg2[%c0_3, %c0_4] : memref<48x24xf32, #tpu.memory_space<vmem>>, vector<48x24xf32>
    %cst_5 = arith.constant dense<0.000000e+00> : vector<12x24xf32>
    %4 = tpu.matmul %2, %3, %cst_5 {dimension_numbers = #tpu.dot_dimension_numbers<[1], [0], [0], [1], [0, 0, 1, 1], [], []>} : vector<12x48xf32>, vector<48x24xf32>, vector<12x24xf32> -> vector<12x24xf32>
    %c0_6 = arith.constant 0 : index
    %c0_7 = arith.constant 0 : index
    %5 = vector.load %arg3[%c0_6, %c0_7] : memref<1x24xf32, #tpu.memory_space<vmem>>, vector<1x24xf32>
    %6 = vector.broadcast %5 : vector<1x24xf32> to vector<12x24xf32>
    %7 = arith.mulf %4, %6 : vector<12x24xf32>
    %cst_8 = arith.constant dense<0.000000e+00> : vector<24xf32>
    %8 = vector.multi_reduction <add>, %7, %cst_8 [0] : vector<12x24xf32> to vector<24xf32>
    %9 = vector.shape_cast %8 : vector<24xf32> to vector<1x24xf32>
    %10 = arith.mulf %7, %7 : vector<12x24xf32>
    %cst_9 = arith.constant dense<0.000000e+00> : vector<24xf32>
    %11 = vector.multi_reduction <add>, %10, %cst_9 [0] : vector<12x24xf32> to vector<24xf32>
    %12 = vector.shape_cast %11 : vector<24xf32> to vector<1x24xf32>
    %c0_10 = arith.constant 0 : index
    %c0_11 = arith.constant 0 : index
    %13 = vector.load %arg9[%c0_10, %c0_11] : memref<24x4xf32, #tpu.memory_space<vmem>>, vector<24x4xf32>
    %cst_12 = arith.constant dense<0.000000e+00> : vector<1x4xf32>
    %14 = tpu.matmul %9, %13, %cst_12 {dimension_numbers = #tpu.dot_dimension_numbers<[1], [0], [0], [1], [0, 0, 1, 1], [], []>} : vector<1x24xf32>, vector<24x4xf32>, vector<1x4xf32> -> vector<1x4xf32>
    %c0_13 = arith.constant 0 : index
    %c0_14 = arith.constant 0 : index
    %15 = vector.load %arg9[%c0_13, %c0_14] : memref<24x4xf32, #tpu.memory_space<vmem>>, vector<24x4xf32>
    %cst_15 = arith.constant dense<0.000000e+00> : vector<1x4xf32>
    %16 = tpu.matmul %12, %15, %cst_15 {dimension_numbers = #tpu.dot_dimension_numbers<[1], [0], [0], [1], [0, 0, 1, 1], [], []>} : vector<1x24xf32>, vector<24x4xf32>, vector<1x4xf32> -> vector<1x4xf32>
    %cst_16 = arith.constant 7.812500e-03 : f32
    %17 = vector.broadcast %cst_16 : f32 to vector<1x4xf32>
    %18 = arith.mulf %14, %17 : vector<1x4xf32>
    %cst_17 = arith.constant 7.812500e-03 : f32
    %19 = vector.broadcast %cst_17 : f32 to vector<1x4xf32>
    %20 = arith.mulf %16, %19 : vector<1x4xf32>
    %21 = arith.mulf %18, %18 : vector<1x4xf32>
    %22 = arith.subf %20, %21 : vector<1x4xf32>
    %cst_18 = arith.constant 9.99999974E-6 : f32
    %23 = vector.broadcast %cst_18 : f32 to vector<1x4xf32>
    %24 = arith.addf %22, %23 : vector<1x4xf32>
    %25 = math.rsqrt %24 : vector<1x4xf32>
    %c0_19 = arith.constant 0 : index
    %c0_20 = arith.constant 0 : index
    %26 = vector.load %arg4[%c0_19, %c0_20] : memref<1x4xf32, #tpu.memory_space<vmem>>, vector<1x4xf32>
    %27 = arith.mulf %25, %26 : vector<1x4xf32>
    %c0_21 = arith.constant 0 : index
    %c0_22 = arith.constant 0 : index
    %28 = vector.load %arg5[%c0_21, %c0_22] : memref<1x4xf32, #tpu.memory_space<vmem>>, vector<1x4xf32>
    %29 = arith.mulf %18, %27 : vector<1x4xf32>
    %30 = arith.subf %28, %29 : vector<1x4xf32>
    %c0_23 = arith.constant 0 : index
    %c0_24 = arith.constant 0 : index
    %31 = vector.load %arg10[%c0_23, %c0_24] : memref<4x24xf32, #tpu.memory_space<vmem>>, vector<4x24xf32>
    %cst_25 = arith.constant dense<0.000000e+00> : vector<1x24xf32>
    %32 = tpu.matmul %27, %31, %cst_25 {dimension_numbers = #tpu.dot_dimension_numbers<[1], [0], [0], [1], [0, 0, 1, 1], [], []>} : vector<1x4xf32>, vector<4x24xf32>, vector<1x24xf32> -> vector<1x24xf32>
    %c0_26 = arith.constant 0 : index
    %c0_27 = arith.constant 0 : index
    %33 = vector.load %arg10[%c0_26, %c0_27] : memref<4x24xf32, #tpu.memory_space<vmem>>, vector<4x24xf32>
    %cst_28 = arith.constant dense<0.000000e+00> : vector<1x24xf32>
    %34 = tpu.matmul %30, %33, %cst_28 {dimension_numbers = #tpu.dot_dimension_numbers<[1], [0], [0], [1], [0, 0, 1, 1], [], []>} : vector<1x4xf32>, vector<4x24xf32>, vector<1x24xf32> -> vector<1x24xf32>
    %35 = vector.broadcast %32 : vector<1x24xf32> to vector<12x24xf32>
    %36 = arith.mulf %7, %35 : vector<12x24xf32>
    %37 = vector.broadcast %34 : vector<1x24xf32> to vector<12x24xf32>
    %38 = arith.addf %36, %37 : vector<12x24xf32>
    %c0_29 = arith.constant 0 : index
    %c0_30 = arith.constant 0 : index
    %39 = vector.load %arg6[%c0_29, %c0_30] : memref<1x1xf32, #tpu.memory_space<vmem>>, vector<1x1xf32>
    %cst_31 = arith.constant 0.000000e+00 : f32
    %40 = vector.broadcast %cst_31 : f32 to vector<12x24xf32>
    %41 = arith.maximumf %38, %40 : vector<12x24xf32>
    %cst_32 = arith.constant 0.000000e+00 : f32
    %42 = vector.broadcast %cst_32 : f32 to vector<12x24xf32>
    %43 = arith.minimumf %38, %42 : vector<12x24xf32>
    %44 = vector.broadcast %39 : vector<1x1xf32> to vector<12x24xf32>
    %45 = arith.mulf %44, %43 : vector<12x24xf32>
    %46 = arith.addf %41, %45 : vector<12x24xf32>
    %c0_33 = arith.constant 0 : index
    %c0_34 = arith.constant 0 : index
    %47 = vector.load %arg8[%c0_33, %c0_34] : memref<24x24xf32, #tpu.memory_space<vmem>>, vector<24x24xf32>
    %cst_35 = arith.constant dense<0.000000e+00> : vector<12x24xf32>
    %48 = tpu.matmul %46, %47, %cst_35 {dimension_numbers = #tpu.dot_dimension_numbers<[1], [0], [0], [1], [0, 0, 1, 1], [], []>} : vector<12x24xf32>, vector<24x24xf32>, vector<12x24xf32> -> vector<12x24xf32>
    %cst_36 = arith.constant 0.000000e+00 : f32
    %49 = vector.broadcast %cst_36 : f32 to vector<1x4xf32>
    %50 = arith.maximumf %30, %49 : vector<1x4xf32>
    %cst_37 = arith.constant 0.000000e+00 : f32
    %51 = vector.broadcast %cst_37 : f32 to vector<1x4xf32>
    %52 = arith.minimumf %30, %51 : vector<1x4xf32>
    %53 = vector.broadcast %39 : vector<1x1xf32> to vector<1x4xf32>
    %54 = arith.mulf %53, %52 : vector<1x4xf32>
    %55 = arith.addf %50, %54 : vector<1x4xf32>
    %c0_38 = arith.constant 0 : index
    %c0_39 = arith.constant 0 : index
    %56 = vector.load %arg7[%c0_38, %c0_39] : memref<4x4xf32, #tpu.memory_space<vmem>>, vector<4x4xf32>
    %cst_40 = arith.constant dense<0.000000e+00> : vector<1x4xf32>
    %57 = tpu.matmul %55, %56, %cst_40 {dimension_numbers = #tpu.dot_dimension_numbers<[1], [0], [0], [1], [0, 0, 1, 1], [], []>} : vector<1x4xf32>, vector<4x4xf32>, vector<1x4xf32> -> vector<1x4xf32>
    %c0_41 = arith.constant 0 : index
    %c0_42 = arith.constant 0 : index
    %58 = vector.load %arg11[%c0_41, %c0_42] : memref<4x32xf32, #tpu.memory_space<vmem>>, vector<4x32xf32>
    %cst_43 = arith.constant dense<0.000000e+00> : vector<1x32xf32>
    %59 = tpu.matmul %57, %58, %cst_43 {dimension_numbers = #tpu.dot_dimension_numbers<[1], [0], [0], [1], [0, 0, 1, 1], [], []>} : vector<1x4xf32>, vector<4x32xf32>, vector<1x32xf32> -> vector<1x32xf32>
    %60 = vector.shape_cast %59 : vector<1x32xf32> to vector<1x32xf32>
    %61 = vector.broadcast %60 : vector<1x32xf32> to vector<16x32xf32>
    %c0_44 = arith.constant 0 : index
    %c0_45 = arith.constant 0 : index
    %62 = vector.load %arg12[%c0_44, %c0_45] : memref<16x32xf32, #tpu.memory_space<vmem>>, vector<16x32xf32>
    tpu.vector_store %arg12[%c0_44, %c0_45], %61 {strides = array<i32>} : memref<16x32xf32, #tpu.memory_space<vmem>>, vector<16x32xf32>,
    %63 = vector.extract_strided_slice %48 {offsets = [0, 0], sizes = [6, 24], strides = [1, 1]} : vector<12x24xf32> to vector<6x24xf32>
    %c1 = arith.constant 1 : index
    %c4 = arith.constant 4 : index
    %64 = vector.load %arg12[%c1, %c4] : memref<16x32xf32, #tpu.memory_space<vmem>>, vector<6x24xf32>
    tpu.vector_store %arg12[%c1, %c4], %63 {strides = array<i32>} : memref<16x32xf32, #tpu.memory_space<vmem>>, vector<6x24xf32>,
    %65 = vector.extract_strided_slice %48 {offsets = [6, 0], sizes = [6, 24], strides = [1, 1]} : vector<12x24xf32> to vector<6x24xf32>
    %c9 = arith.constant 9 : index
    %c4_46 = arith.constant 4 : index
    %66 = vector.load %arg12[%c9, %c4_46] : memref<16x32xf32, #tpu.memory_space<vmem>>, vector<6x24xf32>
    tpu.vector_store %arg12[%c9, %c4_46], %65 {strides = array<i32>} : memref<16x32xf32, #tpu.memory_space<vmem>>, vector<6x24xf32>,
    return
  }
}

module attributes {stable_mosaic.version = 11 : i64} {
  func.func @_upsample_stats_kernel(%arg0: i32, %arg1: memref<8x32xf32, #tpu.memory_space<vmem>>, %arg2: memref<16x8xf32, #tpu.memory_space<vmem>>, %arg3: memref<32x64xf32, #tpu.memory_space<vmem>>, %arg4: memref<64x4xf32, #tpu.memory_space<vmem>>, %arg5: memref<2x4xf32, #tpu.memory_space<vmem>>) attributes {dimension_semantics = [#tpu.dimension_semantics<arbitrary>], iteration_bounds = array<i64: 2>, scalar_prefetch = 0 : i64, scratch_operands = 0 : i64, tpu.core_type = #tpu.core_type<tc>, window_params = [{transform_indices = @transform_0, window_bounds = array<i64: 8, 32>}, {pipeline_mode = #tpu.pipeline_mode<synchronous>, transform_indices = @transform_1, window_bounds = array<i64: 16, 8>}, {pipeline_mode = #tpu.pipeline_mode<synchronous>, transform_indices = @transform_2, window_bounds = array<i64: 32, 64>}, {pipeline_mode = #tpu.pipeline_mode<synchronous>, transform_indices = @transform_3, window_bounds = array<i64: 64, 4>}, {pipeline_mode = #tpu.pipeline_mode<synchronous>, transform_indices = @transform_4, window_bounds = array<i64: 2, 4>}]} {
    %c0_i32 = arith.constant 0 : i32
    %0 = arith.cmpi eq, %arg0, %c0_i32 : i32
    %1 = arith.extui %0 : i1 to i32
    %c0_i32_0 = arith.constant 0 : i32
    %2 = arith.cmpi ne, %1, %c0_i32_0 : i32
    scf.if %2 {
      %cst_19 = arith.constant 0.000000e+00 : f32
      %21 = vector.broadcast %cst_19 : f32 to vector<2x4xf32>
      %c0_20 = arith.constant 0 : index
      %c0_21 = arith.constant 0 : index
      %22 = vector.load %arg5[%c0_20, %c0_21] : memref<2x4xf32, #tpu.memory_space<vmem>>, vector<2x4xf32>
      tpu.vector_store %arg5[%c0_20, %c0_21], %21 {strides = array<i32>} : memref<2x4xf32, #tpu.memory_space<vmem>>, vector<2x4xf32>,
    } else {
    }
    %c0 = arith.constant 0 : index
    %c0_1 = arith.constant 0 : index
    %3 = vector.load %arg2[%c0, %c0_1] : memref<16x8xf32, #tpu.memory_space<vmem>>, vector<16x8xf32>
    %c0_2 = arith.constant 0 : index
    %c0_3 = arith.constant 0 : index
    %4 = vector.load %arg1[%c0_2, %c0_3] : memref<8x32xf32, #tpu.memory_space<vmem>>, vector<8x32xf32>
    %cst = arith.constant dense<0.000000e+00> : vector<16x32xf32>
    %5 = tpu.matmul %3, %4, %cst {dimension_numbers = #tpu.dot_dimension_numbers<[1], [0], [0], [1], [0, 0, 1, 1], [], []>} : vector<16x8xf32>, vector<8x32xf32>, vector<16x32xf32> -> vector<16x32xf32>
    %c0_4 = arith.constant 0 : index
    %c0_5 = arith.constant 0 : index
    %6 = vector.load %arg3[%c0_4, %c0_5] : memref<32x64xf32, #tpu.memory_space<vmem>>, vector<32x64xf32>
    %cst_6 = arith.constant dense<0.000000e+00> : vector<16x64xf32>
    %7 = tpu.matmul %5, %6, %cst_6 {dimension_numbers = #tpu.dot_dimension_numbers<[1], [0], [0], [1], [0, 0, 1, 1], [], []>} : vector<16x32xf32>, vector<32x64xf32>, vector<16x64xf32> -> vector<16x64xf32>
    %cst_7 = arith.constant dense<0.000000e+00> : vector<64xf32>
    %8 = vector.multi_reduction <add>, %7, %cst_7 [0] : vector<16x64xf32> to vector<64xf32>
    %9 = vector.shape_cast %8 : vector<64xf32> to vector<1x64xf32>
    %10 = arith.mulf %7, %7 : vector<16x64xf32>
    %cst_8 = arith.constant dense<0.000000e+00> : vector<64xf32>
    %11 = vector.multi_reduction <add>, %10, %cst_8 [0] : vector<16x64xf32> to vector<64xf32>
    %12 = vector.shape_cast %11 : vector<64xf32> to vector<1x64xf32>
    %c0_9 = arith.constant 0 : index
    %c0_10 = arith.constant 0 : index
    %13 = vector.load %arg4[%c0_9, %c0_10] : memref<64x4xf32, #tpu.memory_space<vmem>>, vector<64x4xf32>
    %cst_11 = arith.constant dense<0.000000e+00> : vector<1x4xf32>
    %14 = tpu.matmul %9, %13, %cst_11 {dimension_numbers = #tpu.dot_dimension_numbers<[1], [0], [0], [1], [0, 0, 1, 1], [], []>} : vector<1x64xf32>, vector<64x4xf32>, vector<1x4xf32> -> vector<1x4xf32>
    %c0_12 = arith.constant 0 : index
    %c0_13 = arith.constant 0 : index
    %15 = vector.load %arg4[%c0_12, %c0_13] : memref<64x4xf32, #tpu.memory_space<vmem>>, vector<64x4xf32>
    %cst_14 = arith.constant dense<0.000000e+00> : vector<1x4xf32>
    %16 = tpu.matmul %12, %15, %cst_14 {dimension_numbers = #tpu.dot_dimension_numbers<[1], [0], [0], [1], [0, 0, 1, 1], [], []>} : vector<1x64xf32>, vector<64x4xf32>, vector<1x4xf32> -> vector<1x4xf32>
    %c0_15 = arith.constant 0 : index
    %c0_16 = arith.constant 0 : index
    %17 = vector.load %arg5[%c0_15, %c0_16] : memref<2x4xf32, #tpu.memory_space<vmem>>, vector<2x4xf32>
    %18 = tpu.concatenate %14, %16 in 0 : vector<1x4xf32>, vector<1x4xf32> -> vector<2x4xf32>
    %19 = arith.addf %17, %18 : vector<2x4xf32>
    %c0_17 = arith.constant 0 : index
    %c0_18 = arith.constant 0 : index
    %20 = vector.load %arg5[%c0_17, %c0_18] : memref<2x4xf32, #tpu.memory_space<vmem>>, vector<2x4xf32>
    tpu.vector_store %arg5[%c0_17, %c0_18], %19 {strides = array<i32>} : memref<2x4xf32, #tpu.memory_space<vmem>>, vector<2x4xf32>,
    return
  }
  func.func @transform_0(%arg0: i32) -> (i32, i32) {
    %c0_i32 = arith.constant 0 : i32
    %c0_i32_0 = arith.constant 0 : i32
    return %arg0, %c0_i32 : i32, i32
  }
  func.func @transform_1(%arg0: i32) -> (i32, i32) {
    %c0_i32 = arith.constant 0 : i32
    %c0_i32_0 = arith.constant 0 : i32
    %c0_i32_1 = arith.constant 0 : i32
    return %c0_i32, %c0_i32_0 : i32, i32
  }
  func.func @transform_2(%arg0: i32) -> (i32, i32) {
    %c0_i32 = arith.constant 0 : i32
    %c0_i32_0 = arith.constant 0 : i32
    %c0_i32_1 = arith.constant 0 : i32
    return %c0_i32, %c0_i32_0 : i32, i32
  }
  func.func @transform_3(%arg0: i32) -> (i32, i32) {
    %c0_i32 = arith.constant 0 : i32
    %c0_i32_0 = arith.constant 0 : i32
    %c0_i32_1 = arith.constant 0 : i32
    return %c0_i32, %c0_i32_0 : i32, i32
  }
  func.func @transform_4(%arg0: i32) -> (i32, i32) {
    %c0_i32 = arith.constant 0 : i32
    %c0_i32_0 = arith.constant 0 : i32
    %c0_i32_1 = arith.constant 0 : i32
    return %c0_i32, %c0_i32_0 : i32, i32
  }
}

module attributes {stable_mosaic.version = 11 : i64} {
  func.func @_upsample_bn_kernel(%arg0: i32, %arg1: memref<8x32xf32, #tpu.memory_space<vmem>>, %arg2: memref<16x8xf32, #tpu.memory_space<vmem>>, %arg3: memref<32x64xf32, #tpu.memory_space<vmem>>, %arg4: memref<2x4xf32, #tpu.memory_space<vmem>>, %arg5: memref<1x4xf32, #tpu.memory_space<vmem>>, %arg6: memref<1x4xf32, #tpu.memory_space<vmem>>, %arg7: memref<4x64xf32, #tpu.memory_space<vmem>>, %arg8: memref<16x64xf32, #tpu.memory_space<vmem>>) attributes {dimension_semantics = [#tpu.dimension_semantics<parallel>], iteration_bounds = array<i64: 2>, scalar_prefetch = 0 : i64, scratch_operands = 0 : i64, tpu.core_type = #tpu.core_type<tc>, window_params = [{transform_indices = @transform_0, window_bounds = array<i64: 8, 32>}, {pipeline_mode = #tpu.pipeline_mode<synchronous>, transform_indices = @transform_1, window_bounds = array<i64: 16, 8>}, {pipeline_mode = #tpu.pipeline_mode<synchronous>, transform_indices = @transform_2, window_bounds = array<i64: 32, 64>}, {pipeline_mode = #tpu.pipeline_mode<synchronous>, transform_indices = @transform_3, window_bounds = array<i64: 2, 4>}, {pipeline_mode = #tpu.pipeline_mode<synchronous>, transform_indices = @transform_4, window_bounds = array<i64: 1, 4>}, {pipeline_mode = #tpu.pipeline_mode<synchronous>, transform_indices = @transform_5, window_bounds = array<i64: 1, 4>}, {pipeline_mode = #tpu.pipeline_mode<synchronous>, transform_indices = @transform_6, window_bounds = array<i64: 4, 64>}, {transform_indices = @transform_7, window_bounds = array<i64: 16, 64>}]} {
    %c0 = arith.constant 0 : index
    %c0_0 = arith.constant 0 : index
    %0 = vector.load %arg2[%c0, %c0_0] : memref<16x8xf32, #tpu.memory_space<vmem>>, vector<16x8xf32>
    %c0_1 = arith.constant 0 : index
    %c0_2 = arith.constant 0 : index
    %1 = vector.load %arg1[%c0_1, %c0_2] : memref<8x32xf32, #tpu.memory_space<vmem>>, vector<8x32xf32>
    %cst = arith.constant dense<0.000000e+00> : vector<16x32xf32>
    %2 = tpu.matmul %0, %1, %cst {dimension_numbers = #tpu.dot_dimension_numbers<[1], [0], [0], [1], [0, 0, 1, 1], [], []>} : vector<16x8xf32>, vector<8x32xf32>, vector<16x32xf32> -> vector<16x32xf32>
    %c0_3 = arith.constant 0 : index
    %c0_4 = arith.constant 0 : index
    %3 = vector.load %arg3[%c0_3, %c0_4] : memref<32x64xf32, #tpu.memory_space<vmem>>, vector<32x64xf32>
    %cst_5 = arith.constant dense<0.000000e+00> : vector<16x64xf32>
    %4 = tpu.matmul %2, %3, %cst_5 {dimension_numbers = #tpu.dot_dimension_numbers<[1], [0], [0], [1], [0, 0, 1, 1], [], []>} : vector<16x32xf32>, vector<32x64xf32>, vector<16x64xf32> -> vector<16x64xf32>
    %c0_6 = arith.constant 0 : index
    %c0_7 = arith.constant 0 : index
    %5 = vector.load %arg4[%c0_6, %c0_7] : memref<2x4xf32, #tpu.memory_space<vmem>>, vector<1x4xf32>
    %cst_8 = arith.constant 0.001953125 : f32
    %6 = vector.broadcast %cst_8 : f32 to vector<1x4xf32>
    %7 = arith.mulf %5, %6 : vector<1x4xf32>
    %c1 = arith.constant 1 : index
    %c0_9 = arith.constant 0 : index
    %8 = vector.load %arg4[%c1, %c0_9] : memref<2x4xf32, #tpu.memory_space<vmem>>, vector<1x4xf32>
    %cst_10 = arith.constant 0.001953125 : f32
    %9 = vector.broadcast %cst_10 : f32 to vector<1x4xf32>
    %10 = arith.mulf %8, %9 : vector<1x4xf32>
    %11 = arith.mulf %7, %7 : vector<1x4xf32>
    %12 = arith.subf %10, %11 : vector<1x4xf32>
    %cst_11 = arith.constant 9.99999974E-6 : f32
    %13 = vector.broadcast %cst_11 : f32 to vector<1x4xf32>
    %14 = arith.addf %12, %13 : vector<1x4xf32>
    %15 = math.rsqrt %14 : vector<1x4xf32>
    %c0_12 = arith.constant 0 : index
    %c0_13 = arith.constant 0 : index
    %16 = vector.load %arg5[%c0_12, %c0_13] : memref<1x4xf32, #tpu.memory_space<vmem>>, vector<1x4xf32>
    %17 = arith.mulf %15, %16 : vector<1x4xf32>
    %c0_14 = arith.constant 0 : index
    %c0_15 = arith.constant 0 : index
    %18 = vector.load %arg6[%c0_14, %c0_15] : memref<1x4xf32, #tpu.memory_space<vmem>>, vector<1x4xf32>
    %19 = arith.mulf %7, %17 : vector<1x4xf32>
    %20 = arith.subf %18, %19 : vector<1x4xf32>
    %c0_16 = arith.constant 0 : index
    %c0_17 = arith.constant 0 : index
    %21 = vector.load %arg7[%c0_16, %c0_17] : memref<4x64xf32, #tpu.memory_space<vmem>>, vector<4x64xf32>
    %cst_18 = arith.constant dense<0.000000e+00> : vector<1x64xf32>
    %22 = tpu.matmul %17, %21, %cst_18 {dimension_numbers = #tpu.dot_dimension_numbers<[1], [0], [0], [1], [0, 0, 1, 1], [], []>} : vector<1x4xf32>, vector<4x64xf32>, vector<1x64xf32> -> vector<1x64xf32>
    %c0_19 = arith.constant 0 : index
    %c0_20 = arith.constant 0 : index
    %23 = vector.load %arg7[%c0_19, %c0_20] : memref<4x64xf32, #tpu.memory_space<vmem>>, vector<4x64xf32>
    %cst_21 = arith.constant dense<0.000000e+00> : vector<1x64xf32>
    %24 = tpu.matmul %20, %23, %cst_21 {dimension_numbers = #tpu.dot_dimension_numbers<[1], [0], [0], [1], [0, 0, 1, 1], [], []>} : vector<1x4xf32>, vector<4x64xf32>, vector<1x64xf32> -> vector<1x64xf32>
    %25 = vector.broadcast %22 : vector<1x64xf32> to vector<16x64xf32>
    %26 = arith.mulf %4, %25 : vector<16x64xf32>
    %27 = vector.broadcast %24 : vector<1x64xf32> to vector<16x64xf32>
    %28 = arith.addf %26, %27 : vector<16x64xf32>
    %c0_22 = arith.constant 0 : index
    %c0_23 = arith.constant 0 : index
    %29 = vector.load %arg8[%c0_22, %c0_23] : memref<16x64xf32, #tpu.memory_space<vmem>>, vector<16x64xf32>
    tpu.vector_store %arg8[%c0_22, %c0_23], %28 {strides = array<i32>} : memref<16x64xf32, #tpu.memory_space<vmem>>, vector<16x64xf32>,
    return
  }
  func.func @transform_0(%arg0: i32) -> (i32, i32) {
    %c0_i32 = arith.constant 0 : i32
    %c0_i32_0 = arith.constant 0 : i32
    return %arg0, %c0_i32 : i32, i32
  }
  func.func @transform_1(%arg0: i32) -> (i32, i32) {
    %c0_i32 = arith.constant 0 : i32
    %c0_i32_0 = arith.constant 0 : i32
    %c0_i32_1 = arith.constant 0 : i32
    return %c0_i32, %c0_i32_0 : i32, i32
  }
  func.func @transform_2(%arg0: i32) -> (i32, i32) {
    %c0_i32 = arith.constant 0 : i32
    %c0_i32_0 = arith.constant 0 : i32
    %c0_i32_1 = arith.constant 0 : i32
    return %c0_i32, %c0_i32_0 : i32, i32
  }
  func.func @transform_3(%arg0: i32) -> (i32, i32) {
    %c0_i32 = arith.constant 0 : i32
    %c0_i32_0 = arith.constant 0 : i32
    %c0_i32_1 = arith.constant 0 : i32
    return %c0_i32, %c0_i32_0 : i32, i32
  }
  func.func @transform_4(%arg0: i32) -> (i32, i32) {
    %c0_i32 = arith.constant 0 : i32
    %c0_i32_0 = arith.constant 0 : i32
    %c0_i32_1 = arith.constant 0 : i32
    return %c0_i32, %c0_i32_0 : i32, i32
  }
  func.func @transform_5(%arg0: i32) -> (i32, i32) {
    %c0_i32 = arith.constant 0 : i32
    %c0_i32_0 = arith.constant 0 : i32
    %c0_i32_1 = arith.constant 0 : i32
    return %c0_i32, %c0_i32_0 : i32, i32
  }
  func.func @transform_6(%arg0: i32) -> (i32, i32) {
    %c0_i32 = arith.constant 0 : i32
    %c0_i32_0 = arith.constant 0 : i32
    %c0_i32_1 = arith.constant 0 : i32
    return %c0_i32, %c0_i32_0 : i32, i32
  }
  func.func @transform_7(%arg0: i32) -> (i32, i32) {
    %c0_i32 = arith.constant 0 : i32
    %c0_i32_0 = arith.constant 0 : i32
    return %arg0, %c0_i32 : i32, i32
  }
}

</mosaic_0001>

<bundles_post_ra>
// kernel: s2block_forward.4
= control target key start
LH: loop header
LB: loop body
LE: loop exit
PB: predicated region body
PF: predicated region fallthrough
CT: control target
= control target key end

     0   :  { %s745_s15 = smov 0   ;;  %s816_s0 = inlined_call_operand.vmem [shape: f32[16,32], index: 0, kind: input, shape index: {}]   ;;  %s817_s1 = inlined_call_operand.vmem [shape: f32[16,8], index: 1, kind: input, shape index: {}]   ;;  %s818_s2 = inlined_call_operand.vmem [shape: f32[32,64], index: 2, kind: input, shape index: {}]   ;;  %s819_s3 = inlined_call_operand.vmem [shape: f32[64,4], index: 3, kind: input, shape index: {}]   ;;  %s820_s4 = inlined_call_operand.vmem [shape: f32[2,4], index: 4, kind: output, shape index: {}]  }
   0x1 LB: > { %s569_s16 = sadd.s32 4294967295, %s714_s15   ;;  %p572_p0 = scmp.ge.s32.totalorder %s714_s15, 1  ;;  %s714_s15 = sphi %s745_s15, %s14_s15  }
   0x2   : > { %p156_p1 = scmp.lt.s32.totalorder %s714_s15, 3 }
   0x4   : > { %p157_p2 = pnand %p572_p0, %p156_p1 }
   0x5   : > { %p176_p3 = scmp.lt.s32.totalorder (!%p157_p2), %s569_s16, 1  ;;  %p574_p4 = scmp.ne.s32.totalorder (!%p157_p2), %s569_s16, 0 }
   0x6   : > { %160 = sbr.rel (%p157_p2) target bundleno = 686 (0x2ae), region = 36 }
   0xd   : > { %s177_s17 = scalar_select %p176_p3, %s569_s16, 1 }
   0xe   : > { %183 = sbr.rel (%p574_p4) target bundleno = 21 (0x15), region = 40  ;;  %vm184_vm0 = vcmask (!%p574_p4), 25600   ;;  %v716_v0 = vmov (!%p574_p4), 0.0  }
   0xf   : > { %s573_s18 = sshll.u32 %s177_s17, 3  ;;  %185 = vst.msk [vmem:[%s820_s4] sm:$0x3] (!%p574_p4), %vm184_vm0, %v716_v0 }
  0x10   : > { %s179_s21 = scalar_lea.vmem %s816_s0, %s573_s18 }
  0x15 PF: > { %v188_v1 = vld [vmem:[%s179_s21] sm:$0xff]  ;;  %vm189_vm1 = vcmask 64512   ;;  %v187_v3 = vld [vmem:[%s817_s1 + $0x8] sm:$0xff]  ;;  %v273_v6 = vld [vmem:[%s818_s2 + $0x10] sm:$0xff]  ;;  %vm275_vm2 = vcmask 261120   ;;  %v717_v15 = vmov 0.0|0.0  }
  0x16   : > { %v186_v2 = vld [vmem:[%s817_s1] sm:$0xff]  ;;  %610 = vmatprep.subr.mxu0 %v188_v1  ;;  %v272_v5 = vld [vmem:[%s818_s2 + $0x8] sm:$0xff]  ;;  %v274_v8 = vld [vmem:[%s818_s2 + $0x18] sm:$0xff]  ;;  %vm718_vm3 = vmmov 0   ;;  %v719_v25 = vmov 0.0   ;;  %vm357_vm4 = vcmask 523264  }
  0x17   : > { %612 = vmatprep.mubr.msk.f32.mxu0 %vm189_vm1, %v186_v2  ;;  %v271_v4 = vld [vmem:[%s818_s2] sm:$0xff]  ;;  %611 = vmatpush3.msra.mxu0 %v188_v1  ;;  %v668_v9 = vpack.c.bf16 %v274_v8, %v273_v6  ;;  %v379_v13 = vld [vmem:[%s819_s3 + $0x8] sm:$0xff]  ;;  %v380_v16 = vld [vmem:[%s819_s3 + $0x10] sm:$0xff]  ;;  %vm536_vm5 = vcmask 1040384   ;;  %vm539_vm6 = vcmask 25600  }
  0x18   : > { %v664_v7 = vpack.c.bf16 %v272_v5, %v271_v4  ;;  %613 = vmatmul.mubr.msk.f32.vlgmr.msra.gmra.mrb[0].mxu0 %vm189_vm1, %v187_v3  ;;  %v378_v12 = vld [vmem:[%s819_s3] sm:$0xff]  ;;  %672 = vmatprep.subr.bf16.mxu0 %v717_v15  ;;  %v381_v17 = vld [vmem:[%s819_s3 + $0x18] sm:$0xff]  ;;  %v383_v20 = vld [vmem:[%s819_s3 + $0x28] sm:$0xff] }
  0x19   : > { %v673_v14 = vpack.c.bf16 %v379_v13, %v378_v12  ;;  %v676_v18 = vpack.c.bf16 %v381_v17, %v380_v16  ;;  %v382_v19 = vld [vmem:[%s819_s3 + $0x20] sm:$0xff]  ;;  %v384_v22 = vld [vmem:[%s819_s3 + $0x30] sm:$0xff]  ;;  %v385_v23 = vld [vmem:[%s819_s3 + $0x38] sm:$0xff]  ;;  %642 = vmatprep.mubr.msk.f32.mxu0 %vm718_vm3, %v719_v25 }
  0x1a   : > { %665 = vmatprep.subr.bf16.mxu1 %v664_v7  ;;  %v679_v21 = vpack.c.bf16 %v383_v20, %v382_v19  ;;  %v682_v24 = vpack.c.bf16 %v385_v23, %v384_v22  ;;  %v532_v51 = vld [vmem:[%s820_s4] sm:$0x3] }
  0x1b   : > { %667 = vmatpush3.bf16.msra.mxu1 %v664_v7  ;;  %674 = vmatpush3.bf16.msra.mxu0 %v673_v14 }
  0x1c   : > { %669 = vmatprep.subr.bf16.mxu1 %v668_v9  ;;  %675 = vmatprep.subr.bf16.mxu0 %v717_v15 }
  0x1f   : > { %671 = vmatpush3.bf16.msra.mxu1 %v668_v9  ;;  %677 = vmatpush3.bf16.msra.mxu0 %v676_v18 }
  0x20   : > { %684 = vmatprep.subr.bf16.mxu1 %v717_v15  ;;  %678 = vmatprep.subr.bf16.mxu0 %v717_v15 }
  0x23   : > { %680 = vmatpush3.bf16.msra.mxu0 %v679_v21 }
  0x24   : > { %681 = vmatprep.subr.bf16.mxu0 %v717_v15 }
  0x27   : > { %683 = vmatpush3.bf16.msra.mxu0 %v682_v24 }
  0xeb   : > { %v614_v10 = vpop.f32.mrb[0].mxu0 }
  0xec   : > { %v262_v11 = vpop.f32.mrb[1].mxu0 }
  0xed   : > { %623 = vmatprep.mubr.msk.f32.mxu1 %vm275_vm2, %v262_v11 }
  0xee   : > { %624 = vmatmul.mubr.msk.f32.vlgmr.msra.gmra.mrb[0].mxu1 %vm275_vm2, %v614_v10 }
  0xef   : > { %686 = vmatpush3.bf16.msra.mxu1 %v673_v14  ;;  %661 = vmatprep.mubr.msk.f32.mxu1 %vm718_vm3, %v719_v25 }
  0xf0   : > { %687 = vmatprep.subr.bf16.mxu1 %v717_v15 }
  0xf3   : > { %689 = vmatpush3.bf16.msra.mxu1 %v676_v18 }
  0xf4   : > { %690 = vmatprep.subr.bf16.mxu1 %v717_v15 }
  0xf7   : > { %692 = vmatpush3.bf16.msra.mxu1 %v679_v21 }
  0xf8   : > { %693 = vmatprep.subr.bf16.mxu1 %v717_v15 }
  0xfb   : > { %695 = vmatpush3.bf16.msra.mxu1 %v682_v24 }
 0x1c1   : > { %v625_v26 = vpop.f32.mrb[0].mxu1 }
 0x1c2   : > { %v359_v27 = vsel %vm357_vm4, %v625_v26, 0.0  ;;  %v368_v28 = vmul.f32 %v625_v26, %v625_v26  ;;  %v348_v29 = vpop.f32.mrb[1].mxu1 }
 0x1c3   : > { %v358_v30 = vsel %vm357_vm4, %v348_v29, 0.0  ;;  %v367_v31 = vmul.f32 %v348_v29, %v348_v29 }
 0x1c4   : > { %v370_v32 = vsel %vm357_vm4, %v368_v28, 0.0  ;;  %v360_v33 = vadd.f32 %v359_v27, %v358_v30 }
 0x1c5   : > { %v369_v34 = vsel %vm357_vm4, %v367_v31, 0.0 }
 0x1c6   : > { %v361_v35 = vrot.slane %v360_v33, 4  ;;  %v371_v36 = vadd.f32 %v370_v32, %v369_v34 }
 0x1c8   : > { %v362_v37 = vadd.f32 %v361_v35, %v360_v33  ;;  %v372_v38 = vrot.slane %v371_v36, 4 }
 0x1ca   : > { %v363_v39 = vrot.slane %v362_v37, 2  ;;  %v373_v40 = vadd.f32 %v372_v38, %v371_v36 }
 0x1cc   : > { %v364_v41 = vadd.f32 %v363_v39, %v362_v37  ;;  %v374_v42 = vrot.slane %v373_v40, 2 }
 0x1ce   : > { %v365_v43 = vrot.slane %v364_v41, 1  ;;  %v375_v44 = vadd.f32 %v374_v42, %v373_v40 }
 0x1d0   : > { %v366_v45 = vadd.f32 %v365_v43, %v364_v41  ;;  %v376_v46 = vrot.slane %v375_v44, 1 }
 0x1d2   : > { %v377_v47 = vadd.f32 %v376_v46, %v375_v44  ;;  %643 = vmatmul.mubr.msk.f32.vlgmr.msra.gmra.mrb[2].mxu0 %vm357_vm4, %v366_v45 }
 0x1d4   : > { %662 = vmatmul.mubr.msk.f32.vlgmr.msra.gmra.mrb[2].mxu1 %vm357_vm4, %v377_v47 }
 0x2a5   : > { %v455_v48 = vpop.f32.mrb[2].mxu0 }
 0x2a6   : > { %v644_v49 = vpop.f32.mrb[3].mxu0 }
 0x2a7   : > { %v528_v50 = vpop.f32.mrb[2].mxu1 }
 0x2a8   : > { %v534_v52 = vrot.slane %v528_v50, 7  ;;  %v663_v53 = vpop.f32.mrb[3].mxu1 }
 0x2aa   : > { %v537_v54 = vsel %vm536_vm5, %v455_v48, %v534_v52 }
 0x2ab   : > { %v538_v55 = vadd.f32 %v537_v54, %v532_v51 }
 0x2ad   : > { %540 = vst.msk [vmem:[%s820_s4] sm:$0x3] %vm539_vm6, %v538_v55 }
 0x2ae PF: > { %s14_s15 = sadd.s32 1, %s714_s15  }
 0x2af   : > { %p11_p5 = scmp.ge.s32.totalorder %s14_s15, 4  }
 0x2b1   :  { %13 = sbr.rel (!%p11_p5) target bundleno = 1 (0x1), region = 66 }

// kernel: s2block_forward.5
= control target key start
LH: loop header
LB: loop body
LE: loop exit
PB: predicated region body
PF: predicated region fallthrough
CT: control target
= control target key end

     0   :  { %s811_s24 = smov 0   ;;  %s870_s0 = inlined_call_operand.vmem [shape: f32[16,32], index: 0, kind: input, shape index: {}]   ;;  %s871_s1 = inlined_call_operand.vmem [shape: f32[16,8], index: 1, kind: input, shape index: {}]   ;;  %s872_s2 = inlined_call_operand.vmem [shape: f32[32,64], index: 2, kind: input, shape index: {}]   ;;  %s873_s3 = inlined_call_operand.vmem [shape: f32[2,4], index: 3, kind: input, shape index: {}]   ;;  %s874_s4 = inlined_call_operand.vmem [shape: f32[1,4], index: 4, kind: input, shape index: {}]   ;;  %s875_s5 = inlined_call_operand.vmem [shape: f32[1,4], index: 5, kind: input, shape index: {}]   ;;  %s876_s6 = inlined_call_operand.vmem [shape: f32[4,64], index: 6, kind: input, shape index: {}]   ;;  %s877_s7 = inlined_call_operand.vmem [shape: f32[32,64], index: 7, kind: output, shape index: {}]  }
   0x1 LB: > { %s817_s25 = sadd.s32 4294967295, %s767_s24   ;;  %p688_p0 = scmp.ge.s32.totalorder %s767_s24, 1  ;;  %s767_s24 = sphi %s811_s24, %s17_s24  }
   0x2   : > { %p236_p1 = scmp.lt.s32.totalorder %s767_s24, 3 }
   0x4   : > { %p237_p2 = pnand %p688_p0, %p236_p1 }
   0x5   : > { %p267_p3 = scmp.lt.s32.totalorder (!%p237_p2), %s817_s25, 1  ;;  %v277_v0 = vld [vmem:[%s871_s1] sm:$0xff] (!%p237_p2)  ;;  %vm280_vm0 = vcmask (!%p237_p2), 64512   ;;  %v363_v2 = vld [vmem:[%s872_s2 + $0x8] sm:$0xff] (!%p237_p2)  ;;  %v364_v3 = vld [vmem:[%s872_s2 + $0x10] sm:$0xff] (!%p237_p2)  ;;  %vm466_vm1 = vcmask (!%p237_p2), 1043456   ;;  %v613_v30 = vlaneseq (!%p237_p2) }
   0x6   : > { %240 = sbr.rel (%p237_p2) target bundleno = 452 (0x1c4), region = 48  ;;  %v362_v1 = vld [vmem:[%s872_s2] sm:$0xff] (!%p237_p2)  ;;  %717 = vmatprep.mubr.msk.f32.mxu0 (!%p237_p2), %vm280_vm0, %v277_v0  ;;  %v365_v5 = vld [vmem:[%s872_s2 + $0x18] sm:$0xff] (!%p237_p2)  ;;  %v278_v13 = vld [vmem:[%s871_s1 + $0x8] sm:$0xff] (!%p237_p2)  ;;  %v769_v16 = vmov (!%p237_p2), 0.0   ;;  %vm770_vm2 = vmmov (!%p237_p2), 0  }
   0x7   : > { %v741_v4 = vpack.c.bf16 (!%p237_p2), %v363_v2, %v362_v1  ;;  %v448_v6 = vld [vmem:[%s873_s3] sm:$0x1] (!%p237_p2)  ;;  %v450_v7 = vld [vmem:[%s873_s3 + $0x1] sm:$0x1] (!%p237_p2)  ;;  %v745_v8 = vpack.c.bf16 (!%p237_p2), %v365_v5, %v364_v3  ;;  %vm462_vm3 = vcmask (!%p237_p2), 31744   ;;  %vm366_vm4 = vcmask (!%p237_p2), 261120  }
   0x8   : > { %v449_v9 = vmul.f32 (!%p237_p2), 0.001953125, %v448_v6  ;;  %v451_v10 = vmul.f32 (!%p237_p2), 0.001953125, %v450_v7  ;;  %v461_v14 = vld [vmem:[%s876_s6] sm:$0xf] (!%p237_p2)  ;;  %v614_v31 = vshrl.u32 (!%p237_p2), %v613_v30, 7  ;;  %s690_s9 = sshll.u32 (!%p237_p2), %s817_s25, 1 }
   0x9   : > { %742 = vmatprep.subr.bf16.mxu1 (!%p237_p2), %v741_v4  ;;  %v456_v18 = vld [vmem:[%s874_s4] sm:$0x1] (!%p237_p2)  ;;  %p272_p4 = scmp.lt.s32.totalorder (!%p237_p2), %s690_s9, 3  ;;  %vm625_vm5 = vcmask (!%p237_p2), 523264  }
   0xa   : > { %744 = vmatpush3.bf16.msra.mxu1 (!%p237_p2), %v741_v4  ;;  %v452_v11 = vmul.f32 (!%p237_p2), %v449_v9, %v449_v9  ;;  %v458_v22 = vld [vmem:[%s875_s5] sm:$0x1] (!%p237_p2)  ;;  %v615_v32 = vsub.s32 (!%p237_p2), 0, %v614_v31 }
   0xb   : > { %746 = vmatprep.subr.bf16.mxu1 (!%p237_p2), %v745_v8 }
   0xc   : > { %v453_v15 = vsub.f32 (!%p237_p2), %v451_v10, %v452_v11 }
   0xd   : > { %s268_s11 = scalar_select %p267_p3, %s817_s25, 1 }
   0xe   : > { %v454_v17 = vadd.f32 1e-05, %v453_v15  ;;  %748 = vmatpush3.bf16.msra.mxu1 %v745_v8  ;;  %s879_s9 = smov (!%p272_p4, %s690_s9), 3 }
   0xf   : > { %s689_s18 = sshll.u32 %s268_s11, 3  ;;  %s691_s10 = sshll.u32 %s879_s9, 3 }
  0x10   : > { %s270_s21 = scalar_lea.vmem %s870_s0, %s689_s18  ;;  %759 = vrsqrt.f32 %v454_v17  ;;  %s275_s13 = scalar_lea.vmem %s877_s7, %s691_s10 }
  0x11   : > { %v279_v12 = vld [vmem:[%s270_s21] sm:$0xff] }
  0x12   : > { %715 = vmatprep.subr.mxu0 %v279_v12 }
  0x13   : > { %716 = vmatpush3.msra.mxu0 %v279_v12 }
  0x14   : > { %718 = vmatmul.mubr.msk.f32.vlgmr.msra.gmra.mrb[0].mxu0 %vm280_vm0, %v278_v13  ;;  %731 = vmatprep.subr.mxu0 %v769_v16 }
  0x15   : > { %732 = vmatpush3.msk.msra.mxu0 %vm466_vm1, %v461_v14  ;;  %733 = vmatprep.mubr.msk.f32.mxu0 %vm770_vm2, %v769_v16 }
  0x16   : > { %736 = vmatprep.subr.mxu0 %v769_v16 }
  0x1a   : > { %v760_v19 = vpop.eup %759 }
  0x1b   : > { %v457_v20 = vmul.f32 %v760_v19, %v456_v18 }
  0x1d   : > { %734 = vmatmul.mubr.msk.f32.vlgmr.msra.gmra.mrb[2].mxu0 %vm462_vm3, %v457_v20  ;;  %v459_v21 = vmul.f32 %v457_v20, %v449_v9 }
  0x1e   : > { %737 = vmatpush3.msk.msra.mxu0 %vm466_vm1, %v461_v14  ;;  %738 = vmatprep.mubr.msk.f32.mxu0 %vm770_vm2, %v769_v16 }
  0x1f   : > { %v460_v23 = vsub.f32 %v458_v22, %v459_v21 }
  0x21   : > { %739 = vmatmul.mubr.msk.f32.vlgmr.msra.gmra.mrb[4].mxu0 %vm462_vm3, %v460_v23 }
  0xe7   : > { %v719_v24 = vpop.f32.mrb[0].mxu0 }
  0xe8   : > { %v353_v25 = vpop.f32.mrb[1].mxu0 }
  0xe9   : > { %728 = vmatprep.mubr.msk.f32.mxu1 %vm366_vm4, %v353_v25 }
  0xea   : > { %729 = vmatmul.mubr.msk.f32.vlgmr.msra.gmra.mrb[0].mxu1 %vm366_vm4, %v719_v24 }
  0xf0   : > { %v536_v26 = vpop.f32.mrb[2].mxu0 }
  0xf1   : > { %v735_v27 = vpop.f32.mrb[3].mxu0  ;;  %v616_v33 = vrot.slane %v536_v26, %v615_v32 }
  0xf4   : > { %v609_v28 = vpop.f32.mrb[4].mxu0 }
  0xf5   : > { %v740_v29 = vpop.f32.mrb[5].mxu0  ;;  %v622_v34 = vrot.slane %v609_v28, %v615_v32 }
 0x1bd   : > { %v730_v35 = vpop.f32.mrb[0].mxu1 }
 0x1be   : > { %v618_v36 = vmul.f32 %v730_v35, %v616_v33  ;;  %v439_v37 = vpop.f32.mrb[1].mxu1 }
 0x1bf   : > { %v617_v38 = vmul.f32 %v616_v33, %v439_v37 }
 0x1c0   : > { %v624_v39 = vadd.f32 %v622_v34, %v618_v36 }
 0x1c1   : > { %v623_v40 = vadd.f32 %v622_v34, %v617_v38 }
 0x1c2   : > { %627 = vst.msk [vmem:[%s275_s13 + $0x8] sm:$0xff] %vm625_vm5, %v624_v39 }
 0x1c3   : > { %626 = vst.msk [vmem:[%s275_s13] sm:$0xff] %vm625_vm5, %v623_v40 }
 0x1c4 PF: > { %s17_s24 = sadd.s32 1, %s767_s24  }
 0x1c5   : > { %p14_p5 = scmp.ge.s32.totalorder %s17_s24, 4  }
 0x1c7   :  { %16 = sbr.rel (!%p14_p5) target bundleno = 1 (0x1), region = 78 }

// kernel: s2block_forward.3
= control target key start
LH: loop header
LB: loop body
LE: loop exit
PB: predicated region body
PF: predicated region fallthrough
CT: control target
= control target key end

     0   :  { %vm48_vm0 = vcmask 195584   ;;  %vm136_vm1 = vcmask 392192   ;;  %v1021_v20 = vmov 0.0|0.0   ;;  %v1022_v22 = vmov 0.0   ;;  %s1025_s21 = smov 4   ;;  %s1231_s0 = inlined_call_operand.vmem [shape: f32[24,48], index: 0, kind: input, shape index: {}]   ;;  %s1232_s1 = inlined_call_operand.vmem [shape: f32[12,24], index: 1, kind: input, shape index: {}]   ;;  %s1233_s2 = inlined_call_operand.vmem [shape: f32[48,24], index: 2, kind: input, shape index: {}]   ;;  %s1234_s9 = inlined_call_operand.vmem [shape: f32[24,4], index: 9, kind: input, shape index: {}]   ;;  %s1235_s6 = inlined_call_operand.<no memory space> [shape: f32[1,1], index: 6, kind: input, shape index: {}]   ;;  %s1236_s3 = inlined_call_operand.vmem [shape: f32[1,24], index: 3, kind: input, shape index: {}]   ;;  %s1237_s10 = inlined_call_operand.vmem [shape: f32[4,24], index: 10, kind: input, shape index: {}]   ;;  %s1238_s4 = inlined_call_operand.vmem [shape: f32[1,4], index: 4, kind: input, shape index: {}]   ;;  %s1239_s5 = inlined_call_operand.vmem [shape: f32[1,4], index: 5, kind: input, shape index: {}]   ;;  %s1240_s7 = inlined_call_operand.vmem [shape: f32[4,4], index: 7, kind: input, shape index: {}]   ;;  %s1241_s8 = inlined_call_operand.vmem [shape: f32[24,24], index: 8, kind: input, shape index: {}]   ;;  %s1242_s11 = inlined_call_operand.vmem [shape: f32[4,32], index: 11, kind: input, shape index: {}]   ;;  %s1243_s12 = inlined_call_operand.vmem [shape: f32[16,32], index: 12, kind: output, shape index: {}]  }
   0x1   :  { %v45_v0 = vld [vmem:[%s1231_s0] sm:$0xff]  ;;  %v46_v1 = vld [vmem:[%s1231_s0 + $0x8] sm:$0xff]  ;;  %v47_v3 = vld [vmem:[%s1231_s0 + $0x10] sm:$0xff]  ;;  %vm1023_vm2 = vmmov 0   ;;  %v560_v23 = vlaneseq  ;;  %v1024_v24 = vmov 0   ;;  %v17_v25 = vstv %s1235_s6 }
   0x2   :  { %v987_v2 = vpack.c.bf16 %v46_v1, %v45_v0  ;;  %v43_v4 = vld [vmem:[%s1232_s1] sm:$0xff]  ;;  %v131_v6 = vld [vmem:[%s1233_s2 + $0x8] sm:$0xff]  ;;  %v132_v7 = vld [vmem:[%s1233_s2 + $0x10] sm:$0xff]  ;;  %1018 = vset.pattern.permute.xlu0 %v1024_v24  ;;  %18 = vst [vmem:[#allocation2] sm:$0x1] %v17_v25  ;;  %vm228_vm3 = vcmask 191488  }
   0x3   :  { %v130_v5 = vld [vmem:[%s1233_s2] sm:$0xff]  ;;  %922 = vmatprep.mubr.msk.f32.mxu0 %vm48_vm0, %v43_v4  ;;  %v133_v8 = vld [vmem:[%s1233_s2 + $0x18] sm:$0xff]  ;;  %v135_v12 = vld [vmem:[%s1233_s2 + $0x28] sm:$0xff]  ;;  %v561_v26 = vshrl.u32 %v560_v23, 7  ;;  %vm413_vm4 = vcmask 1043456   ;;  %vm409_vm5 = vcmask 31744  }
   0x4   :  { %988 = vmatprep.subr.bf16.mxu0 %v987_v2  ;;  %v991_v9 = vpack.c.bf16 %v131_v6, %v130_v5  ;;  %v995_v10 = vpack.c.bf16 %v133_v8, %v132_v7  ;;  %v134_v11 = vld [vmem:[%s1233_s2 + $0x20] sm:$0xff]  ;;  %v44_v13 = vld [vmem:[%s1232_s1 + $0x8] sm:$0xf]  ;;  %v250_v21 = vld [vmem:[%s1234_s9 + $0x10] sm:$0xff]  ;;  %vm844_vm6 = vcmask 261120   ;;  %vm851_vm7 = vcmask 226336  }
   0x5   :  { %990 = vmatpush3.bf16.msra.mxu0 %v987_v2  ;;  %v999_v14 = vpack.c.bf16 %v135_v12, %v134_v11  ;;  %v248_v17 = vld [vmem:[%s1234_s9] sm:$0xff]  ;;  %v249_v18 = vld [vmem:[%s1234_s9 + $0x8] sm:$0xff]  ;;  %v1144_v27 = vsub.s32 0, %v561_v26  ;;  %vm857_vm8 = vcmask 228390   ;;  %vm859_vm9 = vcmask 224288  }
   0x6   :  { %920 = vmatprep.subr.mxu0 %v47_v3  ;;  %992 = vmatprep.subr.bf16.mxu1 %v991_v9  ;;  %v1004_v19 = vpack.c.bf16 %v249_v18, %v248_v17  ;;  %v869_v30 = vld [vmem:[%s1236_s3] ss:$0 sm:$0xff]  ;;  %v592_v17 = vld [vmem:[%s1241_s8 + $0x10] sm:$0xff] }
   0x7   :  { %994 = vmatpush3.bf16.msra.mxu1 %v991_v9  ;;  %v408_v55 = vld [vmem:[%s1237_s10] sm:$0xf] }
   0x8   :  { %996 = vmatprep.subr.bf16.mxu1 %v995_v10  ;;  %v403_v1 = vld [vmem:[%s1238_s4] sm:$0x1] }
   0x9   :  { %921 = vmatpush3.msra.mxu0 %v47_v3  ;;  %v572_v28 = vld [vmem:[#allocation2] sm:$0x1] }
   0xa   :  { %923 = vmatmul.mubr.msk.f32.vlgmr.msra.gmra.mrb[0].mxu0 %vm48_vm0, %v44_v13  ;;  %1003 = vmatprep.subr.bf16.mxu0 %v1021_v20  ;;  %v581_v29 = vrot.slane %v572_v28, %v1144_v27  ;;  %v405_v5 = vld [vmem:[%s1239_s5] sm:$0x1] }
   0xb   :  { %998 = vmatpush3.bf16.msra.mxu1 %v995_v10  ;;  %1005 = vmatpush3.bf16.msra.mxu0 %v1004_v19  ;;  %v686_v9 = vld [vmem:[%s1240_s7] sm:$0xf] }
   0xc   :  { %1000 = vmatprep.subr.bf16.mxu1 %v999_v14  ;;  %944 = vmatprep.subr.mxu0 %v1022_v22 }
   0xd   :  { %946 = vmatprep.mubr.msk.f32.mxu0 %vm1023_vm2, %v1022_v22  ;;  %677 = vperm.xlu0 %1018, %v572_v28  }
   0xf   :  { %1002 = vmatpush3.bf16.msra.mxu1 %v999_v14  ;;  %945 = vmatpush3.msra.mxu0 %v250_v21  ;;  %v590_v14 = vld [vmem:[%s1241_s8] sm:$0xff] }
  0x10   :  { %958 = vmatprep.subr.mxu1 %v1022_v22  ;;  %1006 = vmatprep.subr.bf16.mxu0 %v1021_v20 }
  0x11   :  { %583 = vperm.xlu0 %1018, %v581_v29  }
  0x8c   :  { %v678_v4 = vpop.permute.xlu0 %677 }
  0x8d   :  { %v683_v8 = vrot.slane %v678_v4, %v1144_v27 }
  0xdd   :  { %v924_v15 = vpop.f32.mrb[0].mxu0 }
  0xde   :  { %v121_v16 = vpop.f32.mrb[1].mxu0 }
  0xdf   :  { %937 = vmatprep.mubr.msk.f32.mxu1 %vm136_vm1, %v121_v16 }
  0xe0   :  { %938 = vmatmul.mubr.msk.f32.vlgmr.msra.gmra.mrb[0].mxu1 %vm136_vm1, %v924_v15  ;;  %v591_v15 = vld [vmem:[%s1241_s8 + $0x8] sm:$0xff] }
  0xe1   :  { %960 = vmatprep.mubr.msk.f32.mxu1 %vm1023_vm2, %v1022_v22  ;;  %959 = vmatpush3.msk.msra.mxu1 %vm413_vm4, %v408_v55  ;;  %v1009_v16 = vpack.c.bf16 %v591_v15, %v590_v14 }
  0xe2   :  { %963 = vmatprep.subr.mxu1 %v1022_v22 }
 0x1b3   :  { %v939_v31 = vpop.f32.mrb[0].mxu1 }
 0x1b4   :  { %v1150_v32 = vmul.f32 %v939_v31, %v869_v30  ;;  %v209_v33 = vpop.f32.mrb[1].mxu1 }
 0x1b5   :  { %v1152_v34 = vmul.f32 %v869_v30, %v209_v33  ;;  %v584_v33 = vpop.permute.xlu0 %583 }
 0x1b6   :  { %v229_v35 = vsel %vm228_vm3, %v1150_v32, 0.0  ;;  %v238_v36 = vmul.f32 %v1150_v32, %v1150_v32 }
 0x1b7   :  { %v227_v37 = vsel %vm48_vm0, %v1152_v34, 0.0  ;;  %v237_v38 = vmul.f32 %v1152_v34, %v1152_v34 }
 0x1b8   :  { %v240_v39 = vsel %vm228_vm3, %v238_v36, 0.0  ;;  %v230_v40 = vadd.f32 %v229_v35, %v227_v37 }
 0x1b9   :  { %v239_v41 = vsel %vm48_vm0, %v237_v38, 0.0 }
 0x1ba   :  { %v231_v42 = vrot.slane %v230_v40, 4  ;;  %v241_v43 = vadd.f32 %v240_v39, %v239_v41 }
 0x1bc   :  { %v232_v44 = vadd.f32 %v231_v42, %v230_v40  ;;  %v242_v45 = vrot.slane %v241_v43, 4 }
 0x1be   :  { %v233_v46 = vrot.slane %v232_v44, 2  ;;  %v243_v47 = vadd.f32 %v242_v45, %v241_v43 }
 0x1c0   :  { %v234_v48 = vadd.f32 %v233_v46, %v232_v44  ;;  %v244_v49 = vrot.slane %v243_v47, 2 }
 0x1c2   :  { %v235_v50 = vrot.slane %v234_v48, 1  ;;  %v245_v51 = vadd.f32 %v244_v49, %v243_v47 }
 0x1c4   :  { %v236_v52 = vadd.f32 %v235_v50, %v234_v48  ;;  %v246_v53 = vrot.slane %v245_v51, 1 }
 0x1c6   :  { %947 = vmatmul.mubr.msk.f32.vlgmr.msra.gmra.mrb[2].mxu0 %vm48_vm0, %v236_v52  ;;  %v247_v54 = vadd.f32 %v246_v53, %v245_v51 }
 0x1c7   :  { %1008 = vmatpush3.bf16.msra.mxu0 %v1004_v19  ;;  %955 = vmatprep.mubr.msk.f32.mxu0 %vm1023_vm2, %v1022_v22 }
 0x1c8   :  { %953 = vmatprep.subr.mxu0 %v1022_v22 }
 0x1cb   :  { %954 = vmatpush3.msra.mxu0 %v250_v21 }
 0x1cc   :  { %956 = vmatmul.mubr.msk.f32.vlgmr.msra.gmra.mrb[4].mxu0 %vm48_vm0, %v247_v54  ;;  %1010 = vmatprep.subr.bf16.mxu0 %v1009_v16 }
 0x1cd   :  { %1012 = vmatpush3.bf16.msra.mxu0 %v1009_v16 }
 0x1ce   :  { %972 = vmatprep.subr.mxu0 %v592_v17 }
 0x1d1   :  { %973 = vmatpush3.msra.mxu0 %v592_v17 }
 0x1d2   :  { %982 = vmatprep.subr.mxu0 %v1022_v22 }
 0x299   :  { %v320_v56 = vpop.f32.mrb[2].mxu0 }
 0x29a   :  { %v948_v57 = vpop.f32.mrb[3].mxu0  ;;  %v397_v58 = vmul.f32 0.0078125, %v320_v56 }
 0x29c   :  { %v399_v60 = vmul.f32 %v397_v58, %v397_v58 }
 0x29f   :  { %v393_v59 = vpop.f32.mrb[4].mxu0 }
 0x2a0   :  { %v398_v61 = vmul.f32 0.0078125, %v393_v59  ;;  %v957_v62 = vpop.f32.mrb[5].mxu0 }
 0x2a2   :  { %v400_v63 = vsub.f32 %v398_v61, %v399_v60 }
 0x2a4   :  { %v401_v0 = vadd.f32 1e-05, %v400_v63 }
 0x2a6   :  { %1019 = vrsqrt.f32 %v401_v0 }
 0x2b0   :  { %v1020_v2 = vpop.eup %1019 }
 0x2b1   :  { %v404_v3 = vmul.f32 %v1020_v2, %v403_v1 }
 0x2b3   :  { %961 = vmatmul.mubr.msk.f32.vlgmr.msra.gmra.mrb[2].mxu1 %vm409_vm5, %v404_v3  ;;  %v406_v6 = vmul.f32 %v404_v3, %v397_v58 }
 0x2b4   :  { %964 = vmatpush3.msk.msra.mxu1 %vm413_vm4, %v408_v55  ;;  %965 = vmatprep.mubr.msk.f32.mxu1 %vm1023_vm2, %v1022_v22 }
 0x2b5   :  { %v407_v7 = vsub.f32 %v405_v5, %v406_v6  ;;  %977 = vmatprep.subr.mxu1 %v1022_v22 }
 0x2b7   :  { %v675_v10 = vmin.f32 %v407_v7, 0.0  ;;  %966 = vmatmul.mubr.msk.f32.vlgmr.msra.gmra.mrb[4].mxu1 %vm409_vm5, %v407_v7  ;;  %v674_v11 = vmax.f32 %v407_v7, 0.0 }
 0x2b8   :  { %978 = vmatpush3.msk.msra.mxu1 %vm413_vm4, %v686_v9  ;;  %979 = vmatprep.mubr.msk.f32.mxu1 %vm1023_vm2, %v1022_v22 }
 0x2b9   :  { %v684_v12 = vmul.f32 %v683_v8, %v675_v10 }
 0x2bb   :  { %v685_v13 = vadd.f32 %v684_v12, %v674_v11 }
 0x2bd   :  { %980 = vmatmul.mubr.msk.f32.vlgmr.msra.gmra.mrb[6].mxu1 %vm409_vm5, %v685_v13 }
 0x386   :  { %v483_v18 = vpop.f32.mrb[2].mxu1 }
 0x387   :  { %v563_v19 = vrot.slane %v483_v18, %v1144_v27  ;;  %v962_v20 = vpop.f32.mrb[3].mxu1 }
 0x389   :  { %v564_v23 = vmul.f32 %v563_v19, %v1152_v34  ;;  %v565_v24 = vmul.f32 %v563_v19, %v1150_v32  ;;  %v763_v32 = vld [vmem:[%s1242_s11] sm:$0xf] }
 0x38a   :  { %v556_v21 = vpop.f32.mrb[4].mxu1 }
 0x38b   :  { %v569_v25 = vrot.slane %v556_v21, %v1144_v27  ;;  %v967_v26 = vpop.f32.mrb[5].mxu1 }
 0x38d   :  { %v570_v28 = vadd.f32 %v569_v25, %v564_v23  ;;  %v571_v29 = vadd.f32 %v569_v25, %v565_v24 }
 0x38f   :  { %v575_v30 = vmin.f32 %v570_v28, 0.0  ;;  %v576_v31 = vmin.f32 %v571_v29, 0.0  ;;  %v573_v36 = vmax.f32 %v570_v28, 0.0  ;;  %v574_v37 = vmax.f32 %v571_v29, 0.0 }
 0x390   :  { %v759_v35 = vpop.f32.mrb[6].mxu1 }
 0x391   :  { %v586_v38 = vmul.f32 %v584_v33, %v575_v30  ;;  %v587_v39 = vmul.f32 %v584_v33, %v576_v31  ;;  %v981_v40 = vpop.f32.mrb[7].mxu1 }
 0x393   :  { %v588_v41 = vadd.f32 %v586_v38, %v573_v36  ;;  %v589_v42 = vadd.f32 %v587_v39, %v574_v37 }
 0x395   :  { %974 = vmatprep.mubr.msk.f32.mxu0 %vm48_vm0, %v588_v41 }
 0x396   :  { %975 = vmatmul.mubr.msk.f32.vlgmr.msra.gmra.mrb[6].mxu0 %vm48_vm0, %v589_v42 }
 0x397   :  { %983 = vmatpush3.msk.msra.mxu0 %vm413_vm4, %v763_v32  ;;  %984 = vmatprep.mubr.msk.f32.mxu0 %vm1023_vm2, %v1022_v22 }
 0x39a   :  { %985 = vmatmul.mubr.msk.f32.vlgmr.msra.gmra.mrb[8].mxu0 %vm409_vm5, %v759_v35 }
 0x469   :  { %v976_v34 = vpop.f32.mrb[6].mxu0 }
 0x46a   :  { %v665_v43 = vpop.f32.mrb[7].mxu0 }
 0x46b   :  { %848 = vrot.lane.b32.xlu1 %v665_v43, %s1025_s21 }
 0x46d   :  { %v836_v44 = vpop.f32.mrb[8].mxu0 }
 0x46e   :  { %v843_v45 = vrot.slane %v836_v44, %v1144_v27  ;;  %v986_v46 = vpop.f32.mrb[9].mxu0 }
 0x46f   :  { %854 = vrot.lane.b32.xlu1 %v976_v34, %s1025_s21 }
 0x470   :  { %845 = vst.msk [vmem:[%s1243_s12] sm:$0xff] %vm844_vm6, %v843_v45  ;;  %846 = vst.msk [vmem:[%s1243_s12 + $0x8] sm:$0xff] %vm844_vm6, %v843_v45 }
 0x4dd   :  { %v849_v22 = vpop.permute.xlu1 %848 }
 0x4de   :  { %852 = vst.msk [vmem:[%s1243_s12 + $0x1] sm:$0x3f] %vm851_vm7, %v849_v22 }
 0x4df   :  { %858 = vst.msk [vmem:[%s1243_s12 + $0x3] sm:$0xc0] %vm857_vm8, %v849_v22 }
 0x4e1   :  { %v855_v27 = vpop.permute.xlu1 %854 }
 0x4e2   :  { %860 = vst.msk [vmem:[%s1243_s12 + $0xb] sm:$0xf] %vm859_vm9, %v855_v27 }

</bundles_post_ra>
